<compile_context>
chip_gen: v7x
topology: tpu7x:2x2x1
jax: 0.10.0
libtpu: 0.0.40
codegen_flags: <defaults>
</compile_context>

<pallas_src>
import functools

import numpy as np

import jax
import jax.numpy as jnp
from jax.experimental import pallas as pl
from jax.experimental.pallas import tpu as pltpu


# ---------------------------------------------------------------------------
# Kernel
# ---------------------------------------------------------------------------
def _linear_kernel(x_ref, w_ref, b_ref, o_ref, acc_ref):
    k = pl.program_id(2)

    @pl.when(k == 0)
    def _():
        # Fold the bias into the accumulator init (the init write exists
        # anyway); broadcast the (1, tn) bias row over the tm rows.
        acc_ref[...] = jnp.broadcast_to(
            b_ref[...].astype(jnp.float32), acc_ref.shape
        )

    # MXU matmul with f32 accumulation.
    acc_ref[...] += jnp.dot(
        x_ref[...], w_ref[...], preferred_element_type=jnp.float32
    )

    # Single store epilogue on the final K step: just cast + store.
    @pl.when(k == pl.num_programs(2) - 1)
    def _():
        o_ref[...] = acc_ref[...].astype(o_ref.dtype)


# ---------------------------------------------------------------------------
# Tiling heuristics
# ---------------------------------------------------------------------------
def _round_up(v, m):
    return ((v + m - 1) // m) * m


def _cdiv(a, b):
    return (a + b - 1) // b


_TK_FULL_CAP = 2048  # use tk == K (single K step, no K padding) up to this


def _choose_tiles(M, K, N, sub):
    """Pick (tm, tn, tk).  tn/tk are multiples of 128 or the full dim, tm a
    multiple of `sub` (8 for f32, 16 for bf16).  With these caps the
    double-buffered VMEM footprint stays < ~20 MiB (fits every generation,
    incl. v7x's 64 MiB physical VMEM)."""
    # --- M tile ---
    tm = min(_round_up(M, sub), 512)

    # --- N tile (lane dense) ---
    tn_cap = 1024 if M <= 64 else 512  # GEMV-ish: widen N, W-stream dominates
    tn = N if N <= tn_cap else tn_cap

    # --- K tile ---
    if K <= _TK_FULL_CAP:
        tk = K  # full reduction in one step, no K padding needed
    else:
        tk = 0
        for cand in (1024, 896, 768, 640, 512, 384, 256, 128):
            if K % cand == 0:
                tk = cand
                break
        if tk == 0:
            tk = 512  # rare path: K will be zero-padded up to a tk multiple

    # v7x: ensure >= 2 parallel blocks so both TensorCores get work.
    if _cdiv(M, tm) == 1 and tn == N and N >= 256:
        tn = _round_up(_cdiv(N, 2), 128)

    return tm, tn, tk


# ---------------------------------------------------------------------------
# Public API
# ---------------------------------------------------------------------------
def mhc_prepare_params(weight, bias):
    """One-time parameter prep (torch stores weight as [out, in])."""
    return jnp.asarray(weight).T, jnp.asarray(bias)  # w_t: [in, out]


@functools.partial(jax.jit, static_argnames=("compute_dtype",))
def mhc_forward(x, w_t, b, *, compute_dtype=None):
    """y = x @ w_t + b, with w_t = [in_features, out_features]."""
    M, K = x.shape
    K2, N = w_t.shape
    assert K == K2
    assert b.shape == (N,)

    out_dtype = x.dtype
    comp_dtype = out_dtype if compute_dtype is None else np.dtype(compute_dtype)
    if x.dtype != comp_dtype:
        x = x.astype(comp_dtype)
    if w_t.dtype != comp_dtype:
        w_t = w_t.astype(comp_dtype)

    comp_itemsize = np.dtype(comp_dtype).itemsize
    sub = {1: 32, 2: 16}.get(comp_itemsize, 8)  # sublane packing per dtype

    tm, tn, tk = _choose_tiles(M, K, N, sub)

    # K must be covered exactly (a masked K-edge block would corrupt the sum).
    Kp = _round_up(K, tk)
    if Kp != K:
        # Rare: K > _TK_FULL_CAP and no 128-multiple divides it.
        x = jnp.pad(x, ((0, 0), (0, Kp - K)))
        w_t = jnp.pad(w_t, ((0, Kp - K), (0, 0)))

    b2d = b.reshape(1, N)
    grid = (_cdiv(M, tm), _cdiv(N, tn), Kp // tk)

    cost = pl.CostEstimate(
        flops=2 * M * N * K,
        bytes_accessed=(M * K + K * N) * comp_itemsize
        + M * N * np.dtype(out_dtype).itemsize
        + N * np.dtype(b.dtype).itemsize,
        transcendentals=0,
    )

    return pl.pallas_call(
        _linear_kernel,
        out_shape=jax.ShapeDtypeStruct((M, N), out_dtype),
        grid_spec=pltpu.PrefetchScalarGridSpec(
            num_scalar_prefetch=0,
            grid=grid,
            in_specs=[
                pl.BlockSpec((tm, tk), lambda i, j, k: (i, k)),
                pl.BlockSpec((tk, tn), lambda i, j, k: (k, j)),
                pl.BlockSpec((1, tn), lambda i, j, k: (0, j)),
            ],
            out_specs=pl.BlockSpec((tm, tn), lambda i, j, k: (i, j)),
            scratch_shapes=[pltpu.VMEM((tm, tn), jnp.float32)],
        ),
        compiler_params=pltpu.CompilerParams(
            dimension_semantics=("parallel", "parallel", "arbitrary"),
            vmem_limit_bytes=48 * 1024 * 1024,
        ),
        cost_estimate=cost,
    )(x, w_t, b2d)


# ---------------------------------------------------------------------------
# Self-test
# ---------------------------------------------------------------------------
if __name__ == "__main__":
    key = jax.random.PRNGKey(0)
    keys = jax.random.split(key, 9)
    HI = jax.lax.Precision.HIGHEST  # exact-f32 reference matmuls

    # --- 1. Small shapes consistent with MHC(input_size, output_size) ------
    batch, input_size, output_size = 8, 32, 64
    bound = 1.0 / (input_size ** 0.5)
    weight = jax.random.uniform(
        keys[0], (output_size, input_size), jnp.float32, -bound, bound
    )
    bias = jax.random.uniform(keys[1], (output_size,), jnp.float32, -bound, bound)
    x = jax.random.normal(keys[2], (batch, input_size), jnp.float32)
    w_t, b = mhc_prepare_params(weight, bias)

    y = jax.block_until_ready(mhc_forward(x, w_t, b))
    y_ref = jnp.dot(x, w_t, precision=HI) + b
    assert y.shape == (batch, output_size)
    assert jnp.allclose(y, y_ref, atol=1e-5, rtol=1e-5)

    # --- 2. Ragged M/N edges: masked edge tiles, no padding or slicing -----
    M2, K2, N2 = 260, 384, 320
    bound2 = 1.0 / (K2 ** 0.5)
    w2 = jax.random.uniform(keys[3], (N2, K2), jnp.float32, -bound2, bound2)
    b2 = jax.random.uniform(keys[4], (N2,), jnp.float32, -bound2, bound2)
    x2 = jax.random.normal(keys[5], (M2, K2), jnp.float32)
    w2_t, b2p = mhc_prepare_params(w2, b2)
    y2 = jax.block_until_ready(mhc_forward(x2, w2_t, b2p))
    y2_ref = jnp.dot(x2, w2_t, precision=HI) + b2p
    assert y2.shape == (M2, N2)
    assert jnp.allclose(y2, y2_ref, atol=1e-4, rtol=1e-4)

    # --- 3. bf16 MXU-operand path (f32 accumulation, f32 output) -----------
    M3, K3, N3 = 256, 512, 512
    bound3 = 1.0 / (K3 ** 0.5)
    w3 = jax.random.uniform(keys[6], (N3, K3), jnp.float32, -bound3, bound3)
    b3 = jax.random.uniform(keys[7], (N3,), jnp.float32, -bound3, bound3)
    x3 = jax.random.normal(keys[8], (M3, K3), jnp.float32)
    w3_t, b3p = mhc_prepare_params(w3, b3)
    y3 = jax.block_until_ready(
        mhc_forward(x3, w3_t, b3p, compute_dtype=jnp.bfloat16)
    )
    y3_ref = jnp.dot(x3, w3_t, precision=HI) + b3p
    assert y3.shape == (M3, N3)
    assert jnp.allclose(y3, y3_ref, atol=5e-2, rtol=5e-2)

    print("KERNEL_OK")
</pallas_src>

<mosaic_0001>
module attributes {stable_mosaic.version = 11 : i64} {
  func.func @_linear_kernel(%arg0: i32, %arg1: i32, %arg2: i32, %arg3: memref<8x32xf32, #tpu.memory_space<vmem>>, %arg4: memref<32x64xf32, #tpu.memory_space<vmem>>, %arg5: memref<1x64xf32, #tpu.memory_space<vmem>>, %arg6: memref<8x64xf32, #tpu.memory_space<vmem>>, %arg7: memref<8x64xf32, #tpu.memory_space<vmem>>) attributes {dimension_semantics = [#tpu.dimension_semantics<parallel>, #tpu.dimension_semantics<parallel>, #tpu.dimension_semantics<arbitrary>], iteration_bounds = array<i64: 1, 1, 1>, scalar_prefetch = 0 : i64, scratch_operands = 1 : i64, tpu.core_type = #tpu.core_type<tc>, window_params = [{transform_indices = @transform_0, window_bounds = array<i64: 8, 32>}, {transform_indices = @transform_1, window_bounds = array<i64: 32, 64>}, {transform_indices = @transform_2, window_bounds = array<i64: 1, 64>}, {transform_indices = @transform_3, window_bounds = array<i64: 8, 64>}]} {
    %c0_i32 = arith.constant 0 : i32
    %0 = arith.cmpi eq, %arg2, %c0_i32 : i32
    %1 = arith.extui %0 : i1 to i32
    %c0_i32_0 = arith.constant 0 : i32
    %2 = arith.cmpi ne, %1, %c0_i32_0 : i32
    scf.if %2 {
      %c0_10 = arith.constant 0 : index
      %c0_11 = arith.constant 0 : index
      %12 = vector.load %arg5[%c0_10, %c0_11] : memref<1x64xf32, #tpu.memory_space<vmem>>, vector<1x64xf32>
      %13 = vector.shape_cast %12 : vector<1x64xf32> to vector<1x64xf32>
      %14 = vector.broadcast %13 : vector<1x64xf32> to vector<8x64xf32>
      %c0_12 = arith.constant 0 : index
      %c0_13 = arith.constant 0 : index
      %15 = vector.load %arg7[%c0_12, %c0_13] : memref<8x64xf32, #tpu.memory_space<vmem>>, vector<8x64xf32>
      tpu.vector_store %arg7[%c0_12, %c0_13], %14 {strides = array<i32>} : memref<8x64xf32, #tpu.memory_space<vmem>>, vector<8x64xf32>,
    } else {
    }
    %c0 = arith.constant 0 : index
    %c0_1 = arith.constant 0 : index
    %3 = vector.load %arg7[%c0, %c0_1] : memref<8x64xf32, #tpu.memory_space<vmem>>, vector<8x64xf32>
    %c0_2 = arith.constant 0 : index
    %c0_3 = arith.constant 0 : index
    %4 = vector.load %arg3[%c0_2, %c0_3] : memref<8x32xf32, #tpu.memory_space<vmem>>, vector<8x32xf32>
    %c0_4 = arith.constant 0 : index
    %c0_5 = arith.constant 0 : index
    %5 = vector.load %arg4[%c0_4, %c0_5] : memref<32x64xf32, #tpu.memory_space<vmem>>, vector<32x64xf32>
    %cst = arith.constant dense<0.000000e+00> : vector<8x64xf32>
    %6 = tpu.matmul %4, %5, %cst {dimension_numbers = #tpu.dot_dimension_numbers<[1], [0], [0], [1], [0, 0, 1, 1], [], []>} : vector<8x32xf32>, vector<32x64xf32>, vector<8x64xf32> -> vector<8x64xf32>
    %7 = arith.addf %3, %6 : vector<8x64xf32>
    %c0_6 = arith.constant 0 : index
    %c0_7 = arith.constant 0 : index
    %8 = vector.load %arg7[%c0_6, %c0_7] : memref<8x64xf32, #tpu.memory_space<vmem>>, vector<8x64xf32>
    tpu.vector_store %arg7[%c0_6, %c0_7], %7 {strides = array<i32>} : memref<8x64xf32, #tpu.memory_space<vmem>>, vector<8x64xf32>,
    %c0_i32_8 = arith.constant 0 : i32
    %9 = arith.cmpi eq, %arg2, %c0_i32_8 : i32
    %10 = arith.extui %9 : i1 to i32
    %c0_i32_9 = arith.constant 0 : i32
    %11 = arith.cmpi ne, %10, %c0_i32_9 : i32
    scf.if %11 {
      %c0_10 = arith.constant 0 : index
      %c0_11 = arith.constant 0 : index
      %12 = vector.load %arg7[%c0_10, %c0_11] : memref<8x64xf32, #tpu.memory_space<vmem>>, vector<8x64xf32>
      %c0_12 = arith.constant 0 : index
      %c0_13 = arith.constant 0 : index
      %13 = vector.load %arg6[%c0_12, %c0_13] : memref<8x64xf32, #tpu.memory_space<vmem>>, vector<8x64xf32>
      tpu.vector_store %arg6[%c0_12, %c0_13], %12 {strides = array<i32>} : memref<8x64xf32, #tpu.memory_space<vmem>>, vector<8x64xf32>,
    } else {
    }
    return
  }
  func.func @transform_0(%arg0: i32, %arg1: i32, %arg2: i32) -> (i32, i32) {
    %c0_i32 = arith.constant 0 : i32
    return %arg0, %arg2 : i32, i32
  }
  func.func @transform_1(%arg0: i32, %arg1: i32, %arg2: i32) -> (i32, i32) {
    %c0_i32 = arith.constant 0 : i32
    return %arg2, %arg1 : i32, i32
  }
  func.func @transform_2(%arg0: i32, %arg1: i32, %arg2: i32) -> (i32, i32) {
    %c0_i32 = arith.constant 0 : i32
    %c0_i32_0 = arith.constant 0 : i32
    return %c0_i32, %arg1 : i32, i32
  }
  func.func @transform_3(%arg0: i32, %arg1: i32, %arg2: i32) -> (i32, i32) {
    %c0_i32 = arith.constant 0 : i32
    return %arg0, %arg1 : i32, i32
  }
}

</mosaic_0001>

<bundles_post_ra>
// kernel: mhc_forward.1
= control target key start
LH: loop header
LB: loop body
LE: loop exit
PB: predicated region body
PF: predicated region fallthrough
CT: control target
= control target key end

     0   :  { %8 = vsyncpa [#allocation4], 0  ;;  %s339_s0 = inlined_call_operand.hbm [shape: f32[8,32], index: 0, kind: input, shape index: {}]   ;;  %s340_s1 = inlined_call_operand.hbm [shape: f32[32,64], index: 1, kind: input, shape index: {}]   ;;  %s341_s2 = inlined_call_operand.vmem [shape: f32[1,64], index: 2, kind: input, shape index: {}]   ;;  %s342_s3 = inlined_call_operand.hbm [shape: f32[8,64], index: 3, kind: output, shape index: {}]  }
   0x1   :  { %9 = vsyncpa [#allocation7], 0 }
   0x2   :  { %10 = vsyncpa [#allocation5], 0  ;;  %s262_s12 = smov [#allocation3]   ;;  %s263_s14 = smov [#allocation6]  }
   0x3   :  { %s17_s13 = sshll.u32 %s262_s12, 4  ;;  %s26_s15 = sshll.u32 %s263_s14, 4  ;;  %s18_s13 = int_to_ptr.vmem [resolvable:$true] %s17_s13  ;;  %s290_s15 = int_to_ptr.vmem [resolvable:$true] %s26_s15 }
   0x4   :  { %s190_s18 = scalar_lea.hbm %s339_s0, 128 }
   0x5   :  { %p191_p0 = scmp.ne.s32.totalorder %s339_s0, %s190_s18  ;;  %p194_p1 = scmp.lt.u32.totalorder %s190_s18, %s339_s0 }
   0x7   :  { %p196_p2 = pnand %p194_p1, %p191_p0 }
   0x9   :  { %199 = shalt.err (!%p196_p2)
}
   0xa   :  { %s200_s23 = scalar_lea.vmem %s18_s13, 128  ;;  %p205_p4 = scmp.lt.s32.totalorder %s18_s13, %s18_s13 }
   0xb   :  { %p201_p3 = scmp.ne.s32.totalorder %s18_s13, %s200_s23  ;;  %p206_p5 = scmp.lt.s32.totalorder %s200_s23, %s200_s23 }
   0xd   :  { %p207_p6 = por %p206_p5, %p205_p4 }
   0xf   :  { %p208_p7 = pnand %p207_p6, %p201_p3 }
  0x11   :  { %211 = shalt.err (!%p208_p7)
}
  0x12   :  { %20 = dma.hbm_to_vmem [thread:$0]  %s339_s0, 128, %s18_s13, [#allocation4]  }
  0x13   :  { %s212_s28 = scalar_lea.hbm %s340_s1, 512 }
  0x14   :  { %p213_p8 = scmp.ne.s32.totalorder %s340_s1, %s212_s28  ;;  %p216_p9 = scmp.lt.u32.totalorder %s212_s28, %s340_s1 }
  0x16   :  { %p218_p10 = pnand %p216_p9, %p213_p8 }
  0x18   :  { %221 = shalt.err (!%p218_p10)
}
  0x19   :  { %s222_s6 = scalar_lea.vmem %s290_s15, 512  ;;  %p227_p12 = scmp.lt.s32.totalorder %s290_s15, %s290_s15 }
  0x1a   :  { %p223_p11 = scmp.ne.s32.totalorder %s290_s15, %s222_s6  ;;  %p228_p13 = scmp.lt.s32.totalorder %s222_s6, %s222_s6 }
  0x1c   :  { %p229_p0 = por %p228_p13, %p227_p12 }
  0x1e   :  { %p230_p1 = pnand %p229_p0, %p223_p11 }
  0x20   :  { %233 = shalt.err (!%p230_p1)
}
  0x21   :  { %s264_s0 = smov 128   ;;  %s265_s7 = smov 8  }
  0x22   :  { %32 = dma.hbm_to_vmem [thread:$0]  %s340_s1, 512, %s290_s15, [#allocation7], %s264_s0, %s264_s0, %s265_s7  }
  0x23   :  { %256 = dma.done.wait [#allocation4], 128  }
  0x24   :  { %257 = vsyncadd [#allocation4], 4294967168 }
  0x25   :  { %258 = dma.done.wait [#allocation7], 512  }
  0x26   :  { %259 = vsyncadd [#allocation7], 4294966784  ;;  %v266_v0 = vmov 0.0|0.0   ;;  %vm267_vm0 = vmmov 0   ;;  %v268_v1 = vmov 0.0   ;;  %vm52_vm1 = vcmask 523264  }
  0x27   :  { %176 = vmatprep.subr.bf16.mxu0 %v266_v0  ;;  %173 = vmatprep.mubr.msk.f32.mxu0 %vm267_vm0, %v268_v1  ;;  %v56_v2 = vld [vmem:[#allocation6] sm:$0xff]  ;;  %v57_v3 = vld [vmem:[#allocation6 + $0x8] sm:$0xff]  ;;  %v58_v4 = vld [vmem:[#allocation6 + $0x10] sm:$0xff]  ;;  %vm60_vm2 = vcmask 261120   ;;  %s269_s1 = smov [#allocation8]  }
  0x28   :  { %v177_v5 = vpack.c.bf16 %v57_v3, %v56_v2  ;;  %v59_v6 = vld [vmem:[#allocation6 + $0x18] sm:$0xff]  ;;  %v158_v7 = vld [vmem:[%s341_s2] ss:$0 sm:$0xff]  ;;  %s148_s12 = sshll.u32 %s269_s1, 4  ;;  %s149_s12 = int_to_ptr.vmem [resolvable:$true] %s148_s12 }
  0x29   :  { %53 = vst.msk [vmem:[#allocation2] sm:$0xff] %vm52_vm1, %v158_v7  ;;  %v180_v8 = vpack.c.bf16 %v59_v6, %v58_v4  ;;  %v55_v9 = vld [vmem:[#allocation3] sm:$0xff]  ;;  %s234_s2 = scalar_lea.vmem %s149_s12, 128  ;;  %p239_p3 = scmp.lt.s32.totalorder %s149_s12, %s149_s12 }
  0x2a   :  { %178 = vmatpush3.bf16.msra.mxu0 %v177_v5  ;;  %p235_p2 = scmp.ne.s32.totalorder %s149_s12, %s234_s2  ;;  %p240_p4 = scmp.lt.s32.totalorder %s234_s2, %s234_s2 }
  0x2b   :  { %179 = vmatprep.subr.bf16.mxu0 %v266_v0 }
  0x2c   :  { %p241_p5 = por %p240_p4, %p239_p3 }
  0x2e   :  { %181 = vmatpush3.bf16.msra.mxu0 %v180_v8  ;;  %p242_p6 = pnand %p241_p5, %p235_p2 }
  0x30   :  { %v54_v10 = vld [vmem:[#allocation2] sm:$0xff] }
  0x31   :  { %174 = vmatmul.mubr.msk.f32.vlgmr.msra.gmra.mrb[0].mxu0 %vm60_vm2, %v55_v9 }
 0x104   :  { %v130_v11 = vpop.f32.mrb[0].mxu0 }
 0x105   :  { %v134_v12 = vadd.f32 %v130_v11, %v54_v10  ;;  %v175_v13 = vpop.f32.mrb[1].mxu0 }
 0x107   :  { %136 = vst.msk [vmem:[#allocation2] sm:$0xff] %vm52_vm1, %v134_v12 }
 0x10e   :  { %v140_v14 = vld [vmem:[#allocation2] sm:$0xff] }
 0x10f   :  { %141 = vst.msk [vmem:[#allocation8] sm:$0xff] %vm52_vm1, %v140_v14 }
 0x110   :  { %245 = shalt.err (!%p242_p6)
}
 0x111   :  { %s246_s15 = scalar_lea.hbm %s342_s3, 128 }
 0x112   :  { %p247_p7 = scmp.ne.s32.totalorder %s342_s3, %s246_s15  ;;  %p250_p8 = scmp.lt.u32.totalorder %s246_s15, %s342_s3 }
 0x114   :  { %p252_p9 = pnand %p250_p8, %p247_p7 }
 0x116   :  { %255 = shalt.err (!%p252_p9)
}
 0x117   :  { %151 = dma.vmem_to_hbm [thread:$0]  %s149_s12, 128, %s342_s3, [#allocation5]  }
 0x118   :  { %260 = dma.done.wait [#allocation5], 128  }
 0x119   :  { %261 = vsyncadd [#allocation5], 4294967168 }
 0x11a   :  { %155 = vsyncpa [#allocation4], 1 }
 0x11b   :  { %156 = vsyncpa [#allocation7], 1 }
 0x11c   :  { %157 = vsyncpa [#allocation5], 1 }

</bundles_post_ra>
